<compile_context>
chip_gen: v6e
topology: v6e:2x2x1
jax: 0.10.0
libtpu: 0.0.40
codegen_flags: <defaults>
</compile_context>

<pallas_src>
import math

import jax
import jax.numpy as jnp
from jax.experimental import pallas as pl
from jax.experimental.pallas import tpu as pltpu


_LANE_WIDTH = 2048     # lanes per row of the flat [R, C] view (multiple of 128)
_NUM_CORES = 2         # leading "parallel" axis for v7x megacore


def _round_up(x, m):
    return ((x + m - 1) // m) * m


def _vmem_budget_bytes():
    """Byte budget for the double-buffered data blocks of one kernel."""
    cap = None
    try:
        cap = pltpu.get_tpu_info().vmem_capacity_bytes
    except Exception:
        cap = None
    if cap is not None and cap <= (64 << 20):
        # v7x-class: 64 MiB physical VMEM, 32 MiB scoped default.
        return 20 << 20
    # v5e / v6e (128 MiB physical): stay under v5e's 16 MiB scoped default.
    return 12 << 20


def _pick_block_rows(bytes_per_row, *, max_rows=512):
    rows = _vmem_budget_bytes() // max(bytes_per_row, 1)
    rows = int(min(max_rows, max(16, rows)))
    return (rows // 16) * 16


def _flat_layout(M, row_bytes_per_lane):
    """Lane-dense [R, C] view of a flat axis of M elements + row-block size.

    row_bytes_per_lane: double-buffered bytes per (row, lane) summed over all
    blocked arrays of the kernel (used to size the row block from the VMEM
    budget).
    """
    C = min(_LANE_WIDTH, _round_up(M, 128))
    Mpad = _round_up(M, C)          # at most C-1 extra elements
    R = Mpad // C
    block_rows = _pick_block_rows(row_bytes_per_lane * C)
    if R <= block_rows:
        if R >= 32:
            # >= 2 row blocks so both v7x TensorCores get real work.
            tm = _round_up(pl.cdiv(R, 2), 16)
        else:
            tm = R                  # full-extent block
    else:
        tm = block_rows
    return C, Mpad, R, tm


def _pad_flat(flat, Mpad, pad_value):
    M = flat.shape[-1]
    if Mpad == M:
        return flat
    pad = jnp.full(flat.shape[:-1] + (Mpad - M,), pad_value, flat.dtype)
    return jnp.concatenate([flat, pad], axis=-1)


def _pad_boxes(flat4, Mpad):
    """Pad a coords-first (4, M) tlwh slab with unit boxes (finite IoU = 1)."""
    M = flat4.shape[1]
    if Mpad == M:
        return flat4
    pad_vals = jnp.array([0.0, 0.0, 1.0, 1.0], flat4.dtype)[:, None]
    pad = jnp.broadcast_to(pad_vals, (4, Mpad - M))
    return jnp.concatenate([flat4, pad], axis=1)


# ---------------------------------------------------------------------------
# Shared in-kernel pieces
# ---------------------------------------------------------------------------
def _iou_from_tlwh(b1_ref, b2_ref):
    """(4, tm, C) coordinate-first tlwh tiles -> (tm, C) IoU."""
    x11, y11, w1, h1 = b1_ref[0], b1_ref[1], b1_ref[2], b1_ref[3]
    x21, y21, w2, h2 = b2_ref[0], b2_ref[1], b2_ref[2], b2_ref[3]
    x12, y12 = x11 + w1, y11 + h1
    x22, y22 = x21 + w2, y21 + h2
    iw = jnp.maximum(jnp.minimum(x12, x22) - jnp.maximum(x11, x21), 0.0)
    ih = jnp.maximum(jnp.minimum(y12, y22) - jnp.maximum(y11, y21), 0.0)
    cap = iw * ih
    cup = w1 * h1 + w2 * h2 - cap
    # Plain division (bit parity with the reference); 0/0 -> NaN as in torch.
    return cap / cup


def _row_mask(tm, C, valid_rows, steps_per_core):
    """True for rows that hold real data (handles ragged / phantom blocks)."""
    p = pl.program_id(0)
    s = pl.program_id(1)
    base = (p * steps_per_core + s) * tm
    rows = jax.lax.broadcasted_iota(jnp.int32, (tm, C), 0) + base
    return rows < valid_rows


def _accumulate_tile(num_acc, den_acc, iou_tile, obj_tile, row_ok):
    """One grid step of the nan-masked MeanIoU reduction (pure VPU)."""
    iou_f = iou_tile.astype(jnp.float32)
    obj_f = obj_tile.astype(jnp.float32)
    filt = iou_f * obj_f
    valid = jnp.logical_not(jnp.isnan(filt))
    if row_ok is not None:
        valid = jnp.logical_and(valid, row_ok)
    num_t = jnp.where(valid, filt, 0.0)      # nansum(iou * obj_gt) terms
    den_t = jnp.where(valid, obj_f, 0.0)     # (~isnan(filt)) * obj_gt terms

    tm, C = filt.shape
    if tm % 8 == 0:
        # Group-of-8-sublane partial sums: vreg-aligned, pure VPU adds; the
        # cross-lane reduction to a scalar only happens in the final pl.when.
        num_acc[...] += num_t.reshape(tm // 8, 8, C).sum(axis=0)
        den_acc[...] += den_t.reshape(tm // 8, 8, C).sum(axis=0)
    else:
        num_acc[0:1, :] += num_t.sum(axis=0, keepdims=True)
        den_acc[0:1, :] += den_t.sum(axis=0, keepdims=True)


def _write_partials(out_ref, num_acc, den_acc):
    """Reduce the (8, C) accumulators once and store (num, den) per core."""
    num = jnp.sum(num_acc[...])
    den = jnp.sum(den_acc[...])
    lane = jax.lax.broadcasted_iota(jnp.int32, out_ref.shape, 2)
    out_ref[...] = jnp.where(lane == 0, num, jnp.where(lane == 1, den, 0.0))


def _reduction_grid(R, tm):
    nb = pl.cdiv(R, tm)                 # real row blocks
    steps = pl.cdiv(nb, _NUM_CORES)     # row blocks per core
    need_mask = (_NUM_CORES * steps * tm) != R

    def row_block(p, s):
        # Clamp phantom blocks (nb not evenly split across cores) to a real
        # block; their rows are fully masked out in-kernel, so no OOB DMA and
        # no double counting.
        return jnp.minimum(p * steps + s, nb - 1)

    return steps, need_mask, row_block


# ---------------------------------------------------------------------------
# Box IoU (Putil `iou` helper)
# ---------------------------------------------------------------------------
def _iou_kernel(b1_ref, b2_ref, o_ref):
    o_ref[...] = _iou_from_tlwh(b1_ref, b2_ref).astype(o_ref.dtype)


def iou_pallas(box1_cf, box2_cf):
    """Box IoU.

    box1_cf, box2_cf: [4, *spatial] tlwh boxes with the coordinate axis
    LEADING (coords-first producer layout, so no wrapper transpose).
    Returns (iou,) with iou of shape [*spatial, 1] (Putil convention).
    """
    assert box1_cf.shape == box2_cf.shape and box1_cf.shape[0] == 4
    spatial = box1_cf.shape[1:]
    M = math.prod(spatial)
    dtype = box1_cf.dtype
    itm = jnp.dtype(dtype).itemsize

    # double-buffered bytes per (row, lane): 2 box inputs (4 coords) + output
    C, Mpad, R, tm = _flat_layout(M, (4 + 4 + 1) * 2 * itm)
    nb = pl.cdiv(R, tm)

    b1 = _pad_boxes(box1_cf.reshape(4, M), Mpad).reshape(4, R, C)
    b2 = _pad_boxes(box2_cf.reshape(4, M), Mpad).reshape(4, R, C)

    box_spec = pl.BlockSpec((4, tm, C), lambda i: (0, i, 0))
    out_spec = pl.BlockSpec((tm, C), lambda i: (i, 0))

    iou_rc = pl.pallas_call(
        _iou_kernel,
        out_shape=jax.ShapeDtypeStruct((R, C), dtype),
        grid_spec=pltpu.PrefetchScalarGridSpec(
            num_scalar_prefetch=0,
            grid=(nb,),
            in_specs=[box_spec, box_spec],
            out_specs=out_spec,
        ),
        compiler_params=pltpu.CompilerParams(
            dimension_semantics=("parallel",)),
        cost_estimate=pl.CostEstimate(
            flops=13 * Mpad, transcendentals=0,
            bytes_accessed=9 * itm * Mpad),
    )(b1, b2)

    iou_flat = iou_rc.reshape(-1)
    if Mpad != M:
        iou_flat = iou_flat[:M]
    return (iou_flat.reshape(*spatial, 1),)


# ---------------------------------------------------------------------------
# MeanIoU.forward(iou, obj_gt)
# ---------------------------------------------------------------------------
def mean_iou_pallas(iou, obj_gt):
    """MeanIoU.forward: nansum(iou*obj) / ((~isnan(iou*obj)*obj).sum()+1e-32)."""
    assert iou.size == obj_gt.size
    M = iou.size
    itm_i = jnp.dtype(iou.dtype).itemsize
    itm_o = jnp.dtype(obj_gt.dtype).itemsize

    C, Mpad, R, tm = _flat_layout(M, (itm_i + itm_o) * 2)
    steps, need_mask, row_block = _reduction_grid(R, tm)

    iou2d = _pad_flat(iou.reshape(M), Mpad, 0).reshape(R, C)
    obj2d = _pad_flat(obj_gt.reshape(M), Mpad, 0).reshape(R, C)

    def kernel(iou_ref, obj_ref, out_ref, num_acc, den_acc):
        s = pl.program_id(1)

        @pl.when(s == 0)
        def _():
            num_acc[...] = jnp.zeros_like(num_acc)
            den_acc[...] = jnp.zeros_like(den_acc)

        row_ok = _row_mask(tm, C, R, steps) if need_mask else None
        _accumulate_tile(num_acc, den_acc, iou_ref[...], obj_ref[...], row_ok)

        @pl.when(s == pl.num_programs(1) - 1)
        def _():
            _write_partials(out_ref, num_acc, den_acc)

    in_spec = pl.BlockSpec((tm, C), lambda p, s: (row_block(p, s), 0))
    out_spec = pl.BlockSpec((1, 8, 128), lambda p, s: (p, 0, 0))

    partials = pl.pallas_call(
        kernel,
        out_shape=jax.ShapeDtypeStruct((_NUM_CORES, 8, 128), jnp.float32),
        grid_spec=pltpu.PrefetchScalarGridSpec(
            num_scalar_prefetch=0,
            grid=(_NUM_CORES, steps),
            in_specs=[in_spec, in_spec],
            out_specs=out_spec,
            scratch_shapes=[pltpu.VMEM((8, C), jnp.float32),
                            pltpu.VMEM((8, C), jnp.float32)],
        ),
        compiler_params=pltpu.CompilerParams(
            dimension_semantics=("parallel", "arbitrary")),
        cost_estimate=pl.CostEstimate(
            flops=6 * Mpad, transcendentals=0,
            bytes_accessed=(itm_i + itm_o) * Mpad),
    )(iou2d, obj2d)

    num = jnp.sum(partials[:, 0, 0])
    den = jnp.sum(partials[:, 0, 1])
    return num / (den + 1e-32)


# ---------------------------------------------------------------------------
# Fused box-IoU + MeanIoU (no IoU slab round trip through HBM)
# ---------------------------------------------------------------------------
def fused_iou_mean_pallas(box1_cf, box2_cf, obj_gt):
    assert box1_cf.shape == box2_cf.shape and box1_cf.shape[0] == 4
    M = math.prod(box1_cf.shape[1:])
    assert obj_gt.size == M
    itm_b = jnp.dtype(box1_cf.dtype).itemsize
    itm_o = jnp.dtype(obj_gt.dtype).itemsize

    C, Mpad, R, tm = _flat_layout(M, (8 * itm_b + itm_o) * 2)
    steps, need_mask, row_block = _reduction_grid(R, tm)

    b1 = _pad_boxes(box1_cf.reshape(4, M), Mpad).reshape(4, R, C)
    b2 = _pad_boxes(box2_cf.reshape(4, M), Mpad).reshape(4, R, C)
    obj2d = _pad_flat(obj_gt.reshape(M), Mpad, 0).reshape(R, C)

    def kernel(b1_ref, b2_ref, obj_ref, out_ref, num_acc, den_acc):
        s = pl.program_id(1)

        @pl.when(s == 0)
        def _():
            num_acc[...] = jnp.zeros_like(num_acc)
            den_acc[...] = jnp.zeros_like(den_acc)

        iou_tile = _iou_from_tlwh(b1_ref, b2_ref)
        row_ok = _row_mask(tm, C, R, steps) if need_mask else None
        _accumulate_tile(num_acc, den_acc, iou_tile, obj_ref[...], row_ok)

        @pl.when(s == pl.num_programs(1) - 1)
        def _():
            _write_partials(out_ref, num_acc, den_acc)

    box_spec = pl.BlockSpec((4, tm, C), lambda p, s: (0, row_block(p, s), 0))
    obj_spec = pl.BlockSpec((tm, C), lambda p, s: (row_block(p, s), 0))
    out_spec = pl.BlockSpec((1, 8, 128), lambda p, s: (p, 0, 0))

    partials = pl.pallas_call(
        kernel,
        out_shape=jax.ShapeDtypeStruct((_NUM_CORES, 8, 128), jnp.float32),
        grid_spec=pltpu.PrefetchScalarGridSpec(
            num_scalar_prefetch=0,
            grid=(_NUM_CORES, steps),
            in_specs=[box_spec, box_spec, obj_spec],
            out_specs=out_spec,
            scratch_shapes=[pltpu.VMEM((8, C), jnp.float32),
                            pltpu.VMEM((8, C), jnp.float32)],
        ),
        compiler_params=pltpu.CompilerParams(
            dimension_semantics=("parallel", "arbitrary")),
        cost_estimate=pl.CostEstimate(
            flops=19 * Mpad, transcendentals=0,
            bytes_accessed=(8 * itm_b + itm_o) * Mpad),
    )(b1, b2, obj2d)

    num = jnp.sum(partials[:, 0, 0])
    den = jnp.sum(partials[:, 0, 1])
    return num / (den + 1e-32)


# ---------------------------------------------------------------------------
# Pure-JAX references (mirror the PyTorch modules)
# ---------------------------------------------------------------------------
def iou_ref(box1, box2):
    """box1, box2: [..., 4] tlwh (PyTorch trailing-coord layout)."""
    x11, y11, w1, h1 = box1[..., 0], box1[..., 1], box1[..., 2], box1[..., 3]
    x21, y21, w2, h2 = box2[..., 0], box2[..., 1], box2[..., 2], box2[..., 3]
    x12, y12 = x11 + w1, y11 + h1
    x22, y22 = x21 + w2, y21 + h2
    cap = (jnp.clip(jnp.minimum(x12, x22) - jnp.maximum(x11, x21), 0, None)
           * jnp.clip(jnp.minimum(y12, y22) - jnp.maximum(y11, y21), 0, None))
    cup = (x12 - x11) * (y12 - y11) + (x22 - x21) * (y22 - y21) - cap
    return (cap / cup)[..., None]


def mean_iou_ref(iou, obj_gt):
    filt = iou.astype(jnp.float32) * obj_gt.astype(jnp.float32)
    valid = jnp.logical_not(jnp.isnan(filt))
    num = jnp.sum(jnp.where(valid, filt, 0.0))
    den = jnp.sum(valid.astype(filt.dtype) * obj_gt.astype(filt.dtype))
    return num / (den + 1e-32)


if __name__ == "__main__":
    key = jax.random.PRNGKey(0)
    kxy1, kwh1, kxy2, kwh2, kobj, kiou, kobj2 = jax.random.split(key, 7)

    B, N = 8, 256
    # Coords-first [4, B, N] producer layout: no transpose before the kernel.
    xy1 = jax.random.uniform(kxy1, (2, B, N), jnp.float32, 0.0, 10.0)
    wh1 = jax.random.uniform(kwh1, (2, B, N), jnp.float32, 1.0, 5.0)
    xy2 = jax.random.uniform(kxy2, (2, B, N), jnp.float32, 0.0, 10.0)
    wh2 = jax.random.uniform(kwh2, (2, B, N), jnp.float32, 1.0, 5.0)
    box1_cf = jnp.concatenate([xy1, wh1], axis=0)   # [4, B, N] tlwh
    box2_cf = jnp.concatenate([xy2, wh2], axis=0)   # [4, B, N] tlwh

    # Degenerate zero-area pairs -> IoU 0/0 = NaN, exercising MeanIoU's nan path.
    box1_cf = box1_cf.at[2:, :, :4].set(0.0)
    box2_cf = box2_cf.at[2:, :, :4].set(0.0)

    obj_gt = jax.random.bernoulli(kobj, 0.6, (B, N, 1)).astype(jnp.float32)

    # 1) standalone box-IoU kernel
    (iou_p,) = iou_pallas(box1_cf, box2_cf)
    iou_p = jax.block_until_ready(iou_p)
    iou_expected = iou_ref(jnp.moveaxis(box1_cf, 0, -1),
                           jnp.moveaxis(box2_cf, 0, -1))
    assert iou_p.shape == (B, N, 1)
    assert jnp.allclose(iou_p, iou_expected, atol=1e-5, rtol=1e-5,
                        equal_nan=True)

    # 2) MeanIoU.forward(iou, obj_gt) — the module spec.
    mean_p = jax.block_until_ready(mean_iou_pallas(iou_p, obj_gt))
    mean_expected = mean_iou_ref(iou_p, obj_gt)
    assert jnp.allclose(mean_p, mean_expected, atol=1e-6, rtol=1e-4)
    assert bool(jnp.isfinite(mean_p))

    # 3) fused box-IoU + MeanIoU (no IoU round trip through HBM)
    fused_p = jax.block_until_ready(
        fused_iou_mean_pallas(box1_cf, box2_cf, obj_gt))
    assert jnp.allclose(fused_p, mean_expected, atol=1e-6, rtol=1e-4)

    # 4) multi-row-block / ragged MeanIoU (exercises the in-kernel row mask)
    iou_r = jax.random.uniform(kiou, (40, 2048), jnp.float32)
    iou_r = iou_r.at[::7, ::13].set(jnp.nan)
    obj_r = jax.random.bernoulli(kobj2, 0.5, (40, 2048)).astype(jnp.float32)
    mean_r = jax.block_until_ready(mean_iou_pallas(iou_r, obj_r))
    assert jnp.allclose(mean_r, mean_iou_ref(iou_r, obj_r),
                        atol=1e-6, rtol=1e-4)

    # 5) odd size needing only a small (< C elements) column pad
    iou_s = jax.random.uniform(kiou, (7, 75), jnp.float32)
    obj_s = jax.random.bernoulli(kobj2, 0.5, (7, 75)).astype(jnp.float32)
    mean_s = jax.block_until_ready(mean_iou_pallas(iou_s, obj_s))
    assert jnp.allclose(mean_s, mean_iou_ref(iou_s, obj_s),
                        atol=1e-6, rtol=1e-4)

    print("KERNEL_OK")
</pallas_src>

<mosaic_0001>
module attributes {stable_mosaic.version = 11 : i64} {
  func.func @_iou_kernel(%arg0: i32, %arg1: memref<4x1x2048xf32, #tpu.memory_space<vmem>>, %arg2: memref<4x1x2048xf32, #tpu.memory_space<vmem>>, %arg3: memref<1x2048xf32, #tpu.memory_space<vmem>>) attributes {dimension_semantics = [#tpu.dimension_semantics<parallel>], iteration_bounds = array<i64: 1>, scalar_prefetch = 0 : i64, scratch_operands = 0 : i64, tpu.core_type = #tpu.core_type<tc>, window_params = [{transform_indices = @transform_0, window_bounds = array<i64: 4, 1, 2048>}, {transform_indices = @transform_1, window_bounds = array<i64: 4, 1, 2048>}, {transform_indices = @transform_2, window_bounds = array<i64: 1, 2048>}]} {
    %c0 = arith.constant 0 : index
    %c0_0 = arith.constant 0 : index
    %c0_1 = arith.constant 0 : index
    %0 = vector.load %arg1[%c0, %c0_0, %c0_1] : memref<4x1x2048xf32, #tpu.memory_space<vmem>>, vector<1x1x2048xf32>
    %1 = vector.shape_cast %0 : vector<1x1x2048xf32> to vector<1x2048xf32>
    %c1 = arith.constant 1 : index
    %c0_2 = arith.constant 0 : index
    %c0_3 = arith.constant 0 : index
    %2 = vector.load %arg1[%c1, %c0_2, %c0_3] : memref<4x1x2048xf32, #tpu.memory_space<vmem>>, vector<1x1x2048xf32>
    %3 = vector.shape_cast %2 : vector<1x1x2048xf32> to vector<1x2048xf32>
    %c2 = arith.constant 2 : index
    %c0_4 = arith.constant 0 : index
    %c0_5 = arith.constant 0 : index
    %4 = vector.load %arg1[%c2, %c0_4, %c0_5] : memref<4x1x2048xf32, #tpu.memory_space<vmem>>, vector<1x1x2048xf32>
    %5 = vector.shape_cast %4 : vector<1x1x2048xf32> to vector<1x2048xf32>
    %c3 = arith.constant 3 : index
    %c0_6 = arith.constant 0 : index
    %c0_7 = arith.constant 0 : index
    %6 = vector.load %arg1[%c3, %c0_6, %c0_7] : memref<4x1x2048xf32, #tpu.memory_space<vmem>>, vector<1x1x2048xf32>
    %7 = vector.shape_cast %6 : vector<1x1x2048xf32> to vector<1x2048xf32>
    %c0_8 = arith.constant 0 : index
    %c0_9 = arith.constant 0 : index
    %c0_10 = arith.constant 0 : index
    %8 = vector.load %arg2[%c0_8, %c0_9, %c0_10] : memref<4x1x2048xf32, #tpu.memory_space<vmem>>, vector<1x1x2048xf32>
    %9 = vector.shape_cast %8 : vector<1x1x2048xf32> to vector<1x2048xf32>
    %c1_11 = arith.constant 1 : index
    %c0_12 = arith.constant 0 : index
    %c0_13 = arith.constant 0 : index
    %10 = vector.load %arg2[%c1_11, %c0_12, %c0_13] : memref<4x1x2048xf32, #tpu.memory_space<vmem>>, vector<1x1x2048xf32>
    %11 = vector.shape_cast %10 : vector<1x1x2048xf32> to vector<1x2048xf32>
    %c2_14 = arith.constant 2 : index
    %c0_15 = arith.constant 0 : index
    %c0_16 = arith.constant 0 : index
    %12 = vector.load %arg2[%c2_14, %c0_15, %c0_16] : memref<4x1x2048xf32, #tpu.memory_space<vmem>>, vector<1x1x2048xf32>
    %13 = vector.shape_cast %12 : vector<1x1x2048xf32> to vector<1x2048xf32>
    %c3_17 = arith.constant 3 : index
    %c0_18 = arith.constant 0 : index
    %c0_19 = arith.constant 0 : index
    %14 = vector.load %arg2[%c3_17, %c0_18, %c0_19] : memref<4x1x2048xf32, #tpu.memory_space<vmem>>, vector<1x1x2048xf32>
    %15 = vector.shape_cast %14 : vector<1x1x2048xf32> to vector<1x2048xf32>
    %16 = arith.addf %1, %5 : vector<1x2048xf32>
    %17 = arith.addf %3, %7 : vector<1x2048xf32>
    %18 = arith.addf %9, %13 : vector<1x2048xf32>
    %19 = arith.addf %11, %15 : vector<1x2048xf32>
    %20 = arith.minimumf %16, %18 : vector<1x2048xf32>
    %21 = arith.maximumf %1, %9 : vector<1x2048xf32>
    %22 = arith.subf %20, %21 : vector<1x2048xf32>
    %cst = arith.constant 0.000000e+00 : f32
    %23 = vector.broadcast %cst : f32 to vector<1x2048xf32>
    %24 = arith.maximumf %22, %23 : vector<1x2048xf32>
    %25 = arith.minimumf %17, %19 : vector<1x2048xf32>
    %26 = arith.maximumf %3, %11 : vector<1x2048xf32>
    %27 = arith.subf %25, %26 : vector<1x2048xf32>
    %cst_20 = arith.constant 0.000000e+00 : f32
    %28 = vector.broadcast %cst_20 : f32 to vector<1x2048xf32>
    %29 = arith.maximumf %27, %28 : vector<1x2048xf32>
    %30 = arith.mulf %24, %29 : vector<1x2048xf32>
    %31 = arith.mulf %5, %7 : vector<1x2048xf32>
    %32 = arith.mulf %13, %15 : vector<1x2048xf32>
    %33 = arith.addf %31, %32 : vector<1x2048xf32>
    %34 = arith.subf %33, %30 : vector<1x2048xf32>
    %35 = arith.divf %30, %34 : vector<1x2048xf32>
    %c0_21 = arith.constant 0 : index
    %c0_22 = arith.constant 0 : index
    %36 = vector.load %arg3[%c0_21, %c0_22] : memref<1x2048xf32, #tpu.memory_space<vmem>>, vector<1x2048xf32>
    tpu.vector_store %arg3[%c0_21, %c0_22], %35 {strides = array<i32>} : memref<1x2048xf32, #tpu.memory_space<vmem>>, vector<1x2048xf32>,
    return
  }
  func.func @transform_0(%arg0: i32) -> (i32, i32, i32) {
    %c0_i32 = arith.constant 0 : i32
    %c0_i32_0 = arith.constant 0 : i32
    %c0_i32_1 = arith.constant 0 : i32
    return %c0_i32, %arg0, %c0_i32_0 : i32, i32, i32
  }
  func.func @transform_1(%arg0: i32) -> (i32, i32, i32) {
    %c0_i32 = arith.constant 0 : i32
    %c0_i32_0 = arith.constant 0 : i32
    %c0_i32_1 = arith.constant 0 : i32
    return %c0_i32, %arg0, %c0_i32_0 : i32, i32, i32
  }
  func.func @transform_2(%arg0: i32) -> (i32, i32) {
    %c0_i32 = arith.constant 0 : i32
    %c0_i32_0 = arith.constant 0 : i32
    return %arg0, %c0_i32 : i32, i32
  }
}

</mosaic_0001>

<bundles_post_ra>
// kernel: tpu_custom_call.1
= control target key start
LH: loop header
LB: loop body
LE: loop exit
PB: predicated region body
PF: predicated region fallthrough
CT: control target
= control target key end

     0   :  { %7 = vsyncpa [#allocation3], 0  ;;  %s222_s0 = inlined_call_operand.hbm [shape: f32[4,1,2048], index: 0, kind: input, shape index: {}]   ;;  %s223_s1 = inlined_call_operand.hbm [shape: f32[4,1,2048], index: 1, kind: input, shape index: {}]   ;;  %s224_s2 = inlined_call_operand.hbm [shape: f32[1,2048], index: 2, kind: output, shape index: {}]  }
   0x1   :  { %8 = vsyncpa [#allocation6], 0 }
   0x2   :  { %9 = vsyncpa [#allocation4], 0  ;;  %s193_s9 = smov [#allocation2]  }
   0x3   :  { %s15_s10 = sshll.u32 %s193_s9, 4  ;;  %s16_s10 = int_to_ptr.vmem [resolvable:$true] %s15_s10 }
   0x4   :  { %s135_s11 = scalar_lea.vmem %s16_s10, 1024  ;;  %p140_p1 = scmp.lt.s32.totalorder %s16_s10, %s16_s10 }
   0x5   :  { %p136_p0 = scmp.ne.s32.totalorder %s16_s10, %s135_s11  ;;  %p141_p2 = scmp.lt.s32.totalorder %s135_s11, %s135_s11 }
   0x7   :  { %p142_p3 = por %p141_p2, %p140_p1 }
   0x9   :  { %p143_p4 = pnand %p142_p3, %p136_p0 }
   0xb   :  { %146 = shalt.err (!%p143_p4)
}
   0xc   :  { %s194_s12 = smov 256   ;;  %s195_s13 = smov 16  }
   0xd   :  { %21 = dma.hbm_to_vmem [thread:$0]  %s222_s0, 1024, %s16_s10, [#allocation3], %s194_s12, %s194_s12, %s195_s13  }
   0xe   :  { %s196_s16 = smov [#allocation5]  }
   0xf   :  { %s27_s17 = sshll.u32 %s196_s16, 4  ;;  %s28_s17 = int_to_ptr.vmem [resolvable:$true] %s27_s17 }
  0x10   :  { %s155_s18 = scalar_lea.vmem %s28_s17, 1024  ;;  %p160_p6 = scmp.lt.s32.totalorder %s28_s17, %s28_s17 }
  0x11   :  { %p156_p5 = scmp.ne.s32.totalorder %s28_s17, %s155_s18  ;;  %p161_p7 = scmp.lt.s32.totalorder %s155_s18, %s155_s18 }
  0x13   :  { %p162_p8 = por %p161_p7, %p160_p6 }
  0x15   :  { %p163_p9 = pnand %p162_p8, %p156_p5 }
  0x17   :  { %166 = shalt.err (!%p163_p9)
}
  0x18   :  { %33 = dma.hbm_to_vmem [thread:$0]  %s223_s1, 1024, %s28_s17, [#allocation6], %s194_s12, %s194_s12, %s195_s13  }
  0x19   :  { %187 = dma.done.wait [#allocation3], 1024  }
  0x1a   :  { %188 = vsyncadd [#allocation3], 4294966272 }
  0x1b   :  { %189 = dma.done.wait [#allocation6], 1024  }
  0x1c   :  { %190 = vsyncadd [#allocation6], 4294966272  ;;  %v40_v0 = vld [vmem:[#allocation2] sm:$0xff]  ;;  %v43_v1 = vld [vmem:[#allocation2 + $0x10] sm:$0xff]  ;;  %s197_s0 = smov [#allocation7]  }
  0x1d   :  { %v46_v2 = vld [vmem:[#allocation2 + $0x20] sm:$0xff]  ;;  %v49_v3 = vld [vmem:[#allocation2 + $0x30] sm:$0xff]  ;;  %v41_v10 = vld [vmem:[#allocation2 + $0x8] sm:$0xff]  ;;  %s108_s1 = sshll.u32 %s197_s0, 4  ;;  %s109_s1 = int_to_ptr.vmem [resolvable:$true] %s108_s1 }
  0x1e   :  { %v51_v4 = vld [vmem:[#allocation5] sm:$0xff]  ;;  %v54_v5 = vld [vmem:[#allocation5 + $0x10] sm:$0xff]  ;;  %v62_v6 = vadd.f32 %v46_v2, %v40_v0  ;;  %v64_v9 = vadd.f32 %v49_v3, %v43_v1  ;;  %v44_v15 = vld [vmem:[#allocation2 + $0x18] sm:$0xff]  ;;  %v88_v18 = vmul.f32 %v49_v3, %v46_v2  ;;  %s167_s21 = scalar_lea.vmem %s109_s1, 256  ;;  %p172_p11 = scmp.lt.s32.totalorder %s109_s1, %s109_s1 }
  0x1f   :  { %v57_v7 = vld [vmem:[#allocation5 + $0x20] sm:$0xff]  ;;  %v60_v8 = vld [vmem:[#allocation5 + $0x30] sm:$0xff]  ;;  %v72_v13 = vmax.f32 %v40_v0, %v51_v4  ;;  %v80_v14 = vmax.f32 %v43_v1, %v54_v5  ;;  %v47_v16 = vld [vmem:[#allocation2 + $0x28] sm:$0xff]  ;;  %p168_p10 = scmp.ne.s32.totalorder %s109_s1, %s167_s21  ;;  %p173_p12 = scmp.lt.s32.totalorder %s167_s21, %s167_s21 }
  0x20   :  { %v66_v11 = vadd.f32 %v57_v7, %v51_v4  ;;  %v68_v12 = vadd.f32 %v60_v8, %v54_v5  ;;  %v50_v17 = vld [vmem:[#allocation2 + $0x38] sm:$0xff]  ;;  %v52_v19 = vld [vmem:[#allocation5 + $0x8] sm:$0xff]  ;;  %v63_v22 = vadd.f32 %v47_v16, %v41_v10  ;;  %v90_v26 = vmul.f32 %v60_v8, %v57_v7 }
  0x21   :  { %v55_v20 = vld [vmem:[#allocation5 + $0x18] sm:$0xff]  ;;  %v58_v21 = vld [vmem:[#allocation5 + $0x28] sm:$0xff]  ;;  %v65_v23 = vadd.f32 %v50_v17, %v44_v15  ;;  %v73_v30 = vmax.f32 %v41_v10, %v52_v19  ;;  %v89_v36 = vmul.f32 %v50_v17, %v47_v16  ;;  %p174_p13 = por %p173_p12, %p172_p11 }
  0x22   :  { %v70_v24 = vmin.f32 %v62_v6, %v66_v11  ;;  %v78_v25 = vmin.f32 %v64_v9, %v68_v12  ;;  %v61_v27 = vld [vmem:[#allocation5 + $0x38] sm:$0xff]  ;;  %v67_v28 = vadd.f32 %v58_v21, %v52_v19  ;;  %v81_v31 = vmax.f32 %v44_v15, %v55_v20 }
  0x23   :  { %v69_v29 = vadd.f32 %v61_v27, %v55_v20  ;;  %v91_v37 = vmul.f32 %v61_v27, %v58_v21  ;;  %v92_v40 = vadd.f32 %v90_v26, %v88_v18  ;;  %p175_p0 = pnand %p174_p13, %p168_p10 }
  0x24   :  { %v74_v32 = vsub.f32 %v70_v24, %v72_v13  ;;  %v82_v33 = vsub.f32 %v78_v25, %v80_v14  ;;  %v71_v34 = vmin.f32 %v63_v22, %v67_v28 }
  0x25   :  { %v79_v35 = vmin.f32 %v65_v23, %v69_v29  ;;  %v93_v46 = vadd.f32 %v91_v37, %v89_v36 }
  0x26   :  { %v76_v38 = vmax.f32 %v74_v32, 0.0  ;;  %v84_v39 = vmax.f32 %v82_v33, 0.0  ;;  %v75_v41 = vsub.f32 %v71_v34, %v73_v30 }
  0x27   :  { %v83_v42 = vsub.f32 %v79_v35, %v81_v31 }
  0x28   :  { %v86_v43 = vmul.f32 %v84_v39, %v76_v38  ;;  %v77_v44 = vmax.f32 %v75_v41, 0.0 }
  0x29   :  { %v85_v45 = vmax.f32 %v83_v42, 0.0 }
  0x2a   :  { %v94_v47 = vsub.f32 %v92_v40, %v86_v43 }
  0x2b   :  { %v87_v48 = vmul.f32 %v85_v45, %v77_v44 }
  0x2c   :  { %123 = vrcp.f32 %v94_v47 }
  0x2d   :  { %v95_v49 = vsub.f32 %v93_v46, %v87_v48 }
  0x2f   :  { %125 = vrcp.f32 %v95_v49 }
  0x39   :  { %v124_v50 = vpop.eup %123 }
  0x3a   :  { %v97_v51 = vmul.f32 %v124_v50, %v86_v43 }
  0x3c   :  { %v126_v52 = vpop.eup %125  ;;  %100 = vst [vmem:[#allocation7] sm:$0xff] %v97_v51 }
  0x3d   :  { %v99_v53 = vmul.f32 %v126_v52, %v87_v48 }
  0x3f   :  { %101 = vst [vmem:[#allocation7 + $0x8] sm:$0xff] %v99_v53 }
  0x40   :  { %178 = shalt.err (!%p175_p0)
}
  0x41   :  { %111 = dma.vmem_to_hbm [thread:$0]  %s109_s1, 256, %s224_s2, [#allocation4]  }
  0x42   :  { %191 = dma.done.wait [#allocation4], 256  }
  0x43   :  { %192 = vsyncadd [#allocation4], 4294967040 }
  0x44   :  { %115 = vsyncpa [#allocation3], 1 }
  0x45   :  { %116 = vsyncpa [#allocation6], 1 }
  0x46   :  { %117 = vsyncpa [#allocation4], 1 }

</bundles_post_ra>
